<compile_context>
chip_gen: v6e
topology: v6e:2x2x1
jax: 0.10.0
libtpu: 0.0.40
codegen_flags: <defaults>
</compile_context>

<pallas_src>
import jax
import jax.numpy as jnp
from jax.experimental import pallas as pl
from jax.experimental.pallas import tpu as pltpu

LANE = 128


def _round_up(x, m):
    return (x + m - 1) // m * m


def matmul_bn_relu_kernel(x_ref, w_ref, scale_ref, bias_ref, o_ref):
    """One M-strip per grid step.

    x_ref     : (TM, Kp)   im2col'd activations (bf16), K zero-padded to 128
    w_ref     : (Kp, OCp)  conv weights as (K, OC), zero-padded, bf16 (resident)
    scale_ref : (1, OCp)   folded BN scale  = gamma / sqrt(var + eps)   (f32)
    bias_ref  : (1, OCp)   folded BN bias   = (conv_b - mean)*scale + beta (f32)
    o_ref     : (TM, OCp)  lane-dense output strip (f32)
    """
    acc = jnp.dot(x_ref[...], w_ref[...], preferred_element_type=jnp.float32)
    y = acc * scale_ref[...] + bias_ref[...]        # f32 epilogue (v5e-safe)
    o_ref[...] = jnp.maximum(y, 0.0).astype(o_ref.dtype)


def conv2d_block_forward(x_nchw, conv_w, conv_b, gamma, beta,
                         running_mean, running_var, eps=1e-5, padding=1,
                         tile_m=256):
    """Forward of Conv2dBlock.  x_nchw: (N, Cin, Hin, Win) f32 -> (N, OC, H, W) f32."""
    N, Cin, Hin, Win = x_nchw.shape
    OC, _, KH, KW = conv_w.shape
    H = Hin + 2 * padding - KH + 1
    W = Win + 2 * padding - KW + 1

    # ---- glue (plain JAX): layout conversion, im2col, parameter folding ----
    x = jnp.transpose(x_nchw, (0, 2, 3, 1))                            # NCHW -> NHWC
    x = jnp.pad(x, ((0, 0), (padding, padding), (padding, padding), (0, 0)))

    # im2col: taps ordered (kh, kw, cin); batch folded into the matmul M dim.
    patches = [x[:, kh:kh + H, kw:kw + W, :]
               for kh in range(KH) for kw in range(KW)]
    K = KH * KW * Cin
    x_col = jnp.concatenate(patches, axis=-1).reshape(N * H * W, K)

    # weights (OC, Cin, KH, KW) -> (KH, KW, Cin, OC) -> (K, OC), same tap order.
    w_col = jnp.transpose(conv_w, (2, 3, 1, 0)).reshape(K, OC)

    # Lane-dense zero padding: K,OC up to multiples of 128; M up to tile_m.
    Kp = _round_up(K, LANE)
    OCp = _round_up(OC, LANE)
    M = N * H * W
    Mp = _round_up(M, tile_m)

    # bf16 MXU operands (v6e/v7x peak; fine on v5e), f32 accumulation in-kernel.
    x_col = jnp.pad(x_col, ((0, Mp - M), (0, Kp - K))).astype(jnp.bfloat16)
    w_col = jnp.pad(w_col, ((0, Kp - K), (0, OCp - OC))).astype(jnp.bfloat16)

    scale = gamma / jnp.sqrt(running_var + eps)                        # (OC,)
    bias = (conv_b - running_mean) * scale + beta                      # (OC,)
    scale_p = jnp.pad(scale, (0, OCp - OC)).reshape(1, OCp).astype(jnp.float32)
    bias_p = jnp.pad(bias, (0, OCp - OC)).reshape(1, OCp).astype(jnp.float32)

    grid_m = Mp // tile_m

    # ---- hot path: Pallas kernel, grid over M strips ----
    out_p = pl.pallas_call(
        matmul_bn_relu_kernel,
        out_shape=jax.ShapeDtypeStruct((Mp, OCp), jnp.float32),
        grid_spec=pltpu.PrefetchScalarGridSpec(
            num_scalar_prefetch=0,
            grid=(grid_m,),
            in_specs=[
                pl.BlockSpec((tile_m, Kp), lambda m: (m, 0)),
                pl.BlockSpec((Kp, OCp), lambda m: (0, 0)),   # constant -> resident
                pl.BlockSpec((1, OCp), lambda m: (0, 0)),
                pl.BlockSpec((1, OCp), lambda m: (0, 0)),
            ],
            out_specs=pl.BlockSpec((tile_m, OCp), lambda m: (m, 0)),
        ),
        compiler_params=pltpu.CompilerParams(
            # >=2 parallel steps so both v7x TensorCores get work; near-zero
            # cost on single-TC v5e/v6e.
            dimension_semantics=("parallel",),
        ),
    )(x_col, w_col, scale_p, bias_p)

    out = out_p[:M, :OC].reshape(N, H, W, OC)                          # drop padding
    return jnp.transpose(out, (0, 3, 1, 2))                            # NHWC -> NCHW


def _reference_forward(x, conv_w, conv_b, gamma, beta, rm, rv, eps=1e-5):
    """Pure-JAX reference (lax conv, bf16 operands + f32 accumulation like the kernel)."""
    y = jax.lax.conv_general_dilated(
        x.astype(jnp.bfloat16), conv_w.astype(jnp.bfloat16),
        window_strides=(1, 1), padding=((1, 1), (1, 1)),
        dimension_numbers=("NCHW", "OIHW", "NCHW"),
        preferred_element_type=jnp.float32)
    y = y + conv_b.reshape(1, -1, 1, 1)
    y = (y - rm.reshape(1, -1, 1, 1)) / jnp.sqrt(rv.reshape(1, -1, 1, 1) + eps)
    y = y * gamma.reshape(1, -1, 1, 1) + beta.reshape(1, -1, 1, 1)
    return jnp.maximum(y, 0.0)


if __name__ == "__main__":
    # Small, deterministic synthetic setup.
    N, Cin, Hin, Win = 2, 4, 16, 16
    OC, KH, KW = 8, 3, 3

    key = jax.random.PRNGKey(0)
    kx, kw, kb, kg, kbeta, km, kv = jax.random.split(key, 7)

    x = jax.random.normal(kx, (N, Cin, Hin, Win), dtype=jnp.float32)
    conv_w = 0.1 * jax.random.normal(kw, (OC, Cin, KH, KW), dtype=jnp.float32)
    conv_b = 0.1 * jax.random.normal(kb, (OC,), dtype=jnp.float32)
    gamma = 1.0 + 0.1 * jax.random.normal(kg, (OC,), dtype=jnp.float32)
    beta = 0.1 * jax.random.normal(kbeta, (OC,), dtype=jnp.float32)
    running_mean = 0.1 * jax.random.normal(km, (OC,), dtype=jnp.float32)
    running_var = 1.0 + 0.1 * jax.random.uniform(kv, (OC,), dtype=jnp.float32)

    out = conv2d_block_forward(x, conv_w, conv_b, gamma, beta,
                               running_mean, running_var)
    out = jax.block_until_ready(out)

    ref = _reference_forward(x, conv_w, conv_b, gamma, beta,
                             running_mean, running_var)
    ref = jax.block_until_ready(ref)

    assert out.shape == (N, OC, Hin, Win), out.shape
    assert jnp.allclose(out, ref, rtol=1e-3, atol=1e-3), (
        float(jnp.max(jnp.abs(out - ref))))

    print("KERNEL_OK")
</pallas_src>

<mosaic_0001>
module attributes {stable_mosaic.version = 11 : i64} {
  func.func @matmul_bn_relu_kernel(%arg0: i32, %arg1: memref<256x128xbf16, #tpu.memory_space<vmem>>, %arg2: memref<128x128xbf16, #tpu.memory_space<vmem>>, %arg3: memref<1x128xf32, #tpu.memory_space<vmem>>, %arg4: memref<1x128xf32, #tpu.memory_space<vmem>>, %arg5: memref<256x128xf32, #tpu.memory_space<vmem>>) attributes {dimension_semantics = [#tpu.dimension_semantics<parallel>], iteration_bounds = array<i64: 2>, scalar_prefetch = 0 : i64, scratch_operands = 0 : i64, tpu.core_type = #tpu.core_type<tc>, window_params = [{transform_indices = @transform_0, window_bounds = array<i64: 256, 128>}, {pipeline_mode = #tpu.pipeline_mode<synchronous>, transform_indices = @transform_1, window_bounds = array<i64: 128, 128>}, {pipeline_mode = #tpu.pipeline_mode<synchronous>, transform_indices = @transform_2, window_bounds = array<i64: 1, 128>}, {pipeline_mode = #tpu.pipeline_mode<synchronous>, transform_indices = @transform_3, window_bounds = array<i64: 1, 128>}, {transform_indices = @transform_4, window_bounds = array<i64: 256, 128>}]} {
    %c0 = arith.constant 0 : index
    %c0_0 = arith.constant 0 : index
    %0 = vector.load %arg1[%c0, %c0_0] : memref<256x128xbf16, #tpu.memory_space<vmem>>, vector<256x128xbf16>
    %c0_1 = arith.constant 0 : index
    %c0_2 = arith.constant 0 : index
    %1 = vector.load %arg2[%c0_1, %c0_2] : memref<128x128xbf16, #tpu.memory_space<vmem>>, vector<128x128xbf16>
    %cst = arith.constant dense<0.000000e+00> : vector<256x128xf32>
    %2 = tpu.matmul %0, %1, %cst {dimension_numbers = #tpu.dot_dimension_numbers<[1], [0], [0], [1], [0, 0, 1, 1], [], []>} : vector<256x128xbf16>, vector<128x128xbf16>, vector<256x128xf32> -> vector<256x128xf32>
    %c0_3 = arith.constant 0 : index
    %c0_4 = arith.constant 0 : index
    %3 = vector.load %arg3[%c0_3, %c0_4] : memref<1x128xf32, #tpu.memory_space<vmem>>, vector<1x128xf32>
    %4 = vector.broadcast %3 : vector<1x128xf32> to vector<256x128xf32>
    %5 = arith.mulf %2, %4 : vector<256x128xf32>
    %c0_5 = arith.constant 0 : index
    %c0_6 = arith.constant 0 : index
    %6 = vector.load %arg4[%c0_5, %c0_6] : memref<1x128xf32, #tpu.memory_space<vmem>>, vector<1x128xf32>
    %7 = vector.broadcast %6 : vector<1x128xf32> to vector<256x128xf32>
    %8 = arith.addf %5, %7 : vector<256x128xf32>
    %cst_7 = arith.constant 0.000000e+00 : f32
    %9 = vector.broadcast %cst_7 : f32 to vector<256x128xf32>
    %10 = arith.maximumf %8, %9 : vector<256x128xf32>
    %c0_8 = arith.constant 0 : index
    %c0_9 = arith.constant 0 : index
    %11 = vector.load %arg5[%c0_8, %c0_9] : memref<256x128xf32, #tpu.memory_space<vmem>>, vector<256x128xf32>
    tpu.vector_store %arg5[%c0_8, %c0_9], %10 {strides = array<i32>} : memref<256x128xf32, #tpu.memory_space<vmem>>, vector<256x128xf32>,
    return
  }
  func.func @transform_0(%arg0: i32) -> (i32, i32) {
    %c0_i32 = arith.constant 0 : i32
    %c0_i32_0 = arith.constant 0 : i32
    return %arg0, %c0_i32 : i32, i32
  }
  func.func @transform_1(%arg0: i32) -> (i32, i32) {
    %c0_i32 = arith.constant 0 : i32
    %c0_i32_0 = arith.constant 0 : i32
    %c0_i32_1 = arith.constant 0 : i32
    return %c0_i32, %c0_i32_0 : i32, i32
  }
  func.func @transform_2(%arg0: i32) -> (i32, i32) {
    %c0_i32 = arith.constant 0 : i32
    %c0_i32_0 = arith.constant 0 : i32
    %c0_i32_1 = arith.constant 0 : i32
    return %c0_i32, %c0_i32_0 : i32, i32
  }
  func.func @transform_3(%arg0: i32) -> (i32, i32) {
    %c0_i32 = arith.constant 0 : i32
    %c0_i32_0 = arith.constant 0 : i32
    %c0_i32_1 = arith.constant 0 : i32
    return %c0_i32, %c0_i32_0 : i32, i32
  }
  func.func @transform_4(%arg0: i32) -> (i32, i32) {
    %c0_i32 = arith.constant 0 : i32
    %c0_i32_0 = arith.constant 0 : i32
    return %arg0, %c0_i32 : i32, i32
  }
}

</mosaic_0001>

<bundles_post_ra>
// kernel: tpu_custom_call.1
= control target key start
LH: loop header
LB: loop body
LE: loop exit
PB: predicated region body
PF: predicated region fallthrough
CT: control target
= control target key end

     0   :  { %9 = vsyncpa [#allocation3], 0  ;;  %s1510_s0 = inlined_call_operand.hbm [shape: bf16[512,128], index: 0, kind: input, shape index: {}]   ;;  %s1511_s1 = inlined_call_operand.hbm [shape: bf16[128,128], index: 1, kind: input, shape index: {}]   ;;  %s1512_s2 = inlined_call_operand.vmem [shape: f32[1,128], index: 2, kind: input, shape index: {}]   ;;  %s1513_s3 = inlined_call_operand.vmem [shape: f32[1,128], index: 3, kind: input, shape index: {}]   ;;  %s1514_s4 = inlined_call_operand.hbm [shape: f32[512,128], index: 4, kind: output, shape index: {}]  }
   0x1   :  { %11 = vsyncpa [#allocation3 + $0x1], 0 }
   0x2   :  { %12 = vsyncpa [#allocation6], 0 }
   0x3   :  { %13 = vsyncpa [#allocation4], 0 }
   0x4   :  { %15 = vsyncpa [#allocation4 + $0x1], 0  ;;  %s1199_s15 = smov 0   ;;  %s1201_s16 = smov 0  }
   0x5   :  { %s1203_s17 = smov 0   ;;  %s1205_s18 = smov 0  }
   0x6 LB: > { %s1220_s19 = sadd.s32 4294967295, %s1165_s18   ;;  %s826_s20 = sadd.s32 4294967294, %s1165_s18   ;;  %s1165_s18 = sphi %s1205_s18, %s1536_s18   ;;  %s1161_s17 = sphi %s1203_s17, %s1535_s17   ;;  %s1157_s16 = sphi %s1201_s16, %s1534_s16   ;;  %s1153_s15 = sphi %s1199_s15, %s1533_s15  }
   0x7   : > { %p41_p0 = scmp.ne.s32.totalorder %s1157_s16, %s1153_s15  ;;  %p1515_p1 = scmp.eq.s32.totalorder %s1220_s19, 0 }
   0x8   : > { %p134_p3 = scmp.eq.s32.totalorder %s826_s20, 1  ;;  %p827_p5 = scmp.ge.s32.totalorder %s1165_s18, 1 }
   0x9   : > { %p1229_p4 = por %p1515_p1, %p41_p0  ;;  %p141_p7 = scmp.lt.s32.totalorder %s1165_s18, 3 }
   0xa   : > { %p1234_p6 = por %p134_p3, %p41_p0  ;;  %s1167_s24 = smov [#allocation5]  }
   0xb   : > { %s1519_s21 = scalar_select %p1229_p4, 1, 0 }
   0xc   : > { %s1520_s22 = scalar_select %p1234_p6, 1, 0 }
   0xd   : > { %p1239_p8 = pnand %p827_p5, %p141_p7  ;;  %s153_s25 = sshll.u32 %s1167_s24, 4  ;;  %s154_s25 = int_to_ptr.vmem [resolvable:$true] %s153_s25 }
   0xe   : > { %s1253_s27 = sadd.s32 1, %s1165_s18   ;;  %s28_s28 = sadd.s32 1, %s1161_s17 }
   0xf   : > { %s1521_s23 = scalar_select %p1239_p8, 1, 0 }
  0x10   : > { %p966_p9 = pneg %p1239_p8  ;;  %s25_s29 = ssub.s32 %s1165_s18, %s1253_s27 }
  0x11   : > { %s1054_s30 = scalar_lea.vmem %s154_s25, 1024  ;;  %p1062_p5 = scmp.lt.s32.totalorder %s154_s25, %s154_s25 }
  0x12   : > { %p1248_p11 = pnand %p966_p9, %p1515_p1  ;;  %p1055_p13 = scmp.ne.s32.totalorder %s154_s25, %s1054_s30 }
  0x13   : > { %p1063_p7 = scmp.lt.s32.totalorder %s1054_s30, %s1054_s30 }
  0x14   : > { %p1045_p12 = pneg %p1248_p11 }
  0x15   : > { %p1064_p10 = por %p1063_p7, %p1062_p5 }
  0x16   : > { %p1057_p0 = pnand %p1055_p13, %p1045_p12 }
  0x18   : > { %p1058_p3 = pneg %p1057_p0 }
  0x1a   : > { %p1065_p2 = pnand %p1064_p10, %p1058_p3 }
  0x1c   : > { %1068 = shalt.err (!%p1065_p2)
}
  0x1d   : > { %s1168_s5 = smov 64   ;;  %s1169_s6 = smov 4  }
  0x1e   : > { %969 = dma.hbm_to_vmem [thread:$0]  (!%p1248_p11), %s1511_s1, 1024, %s154_s25, [#allocation6], %s1168_s5, %s1168_s5, %s1169_s6  }
  0x1f   : > { %p26_p2 = scmp.eq.s32.totalorder %s25_s29, 0  ;;  %p35_p9 = scmp.ne.s32.totalorder %s1161_s17, %s1157_s16 }
  0x20   : > { %p36_p10 = scmp.eq.s32.totalorder %s1165_s18, 0  ;;  %p979_p12 = scmp.lt.s32.totalorder %s1165_s18, 2 }
  0x21   : > { %s1273_s9 = scalar_select %p26_p2, %s1161_s17, %s28_s28  }
  0x22   : > { %p37_p13 = por %p36_p10, %p35_p9  ;;  %p1523_p0 = scmp.eq.s32.totalorder %s1220_s19, 1 }
  0x23   : > { %s173_s11 = sand.u32 1, %s1161_s17   ;;  %s868_s12 = sshll.u32 %s1165_s18, 11 }
  0x24   : > { %p1277_p3 = por %p1523_p0, %p35_p9  ;;  %s830_s13 = sshll.u32 %s173_s11, 7 }
  0x25   : > { %s1286_s24 = scalar_lea.hbm %s1510_s0, %s868_s12  ;;  %s177_s25 = scalar_lea.vmem [#allocation2], %s830_s13 }
  0x26   : > { %s1524_s10 = scalar_select %p1277_p3, 1, 0 }
  0x27   : > { %s184_s26 = sshll.u32 %s177_s25, 4  ;;  %p1288_p11 = pnand %p979_p12, %p37_p13  ;;  %s1292_s26 = int_to_ptr.vmem [resolvable:$true] %s184_s26 }
  0x28   : > { %s1294_s29 = scalar_lea.sflag [#allocation3], %s173_s11  ;;  %s1069_s30 = scalar_lea.hbm %s1286_s24, 2048 }
  0x29   : > { %p1070_p5 = scmp.ne.s32.totalorder %s1286_s24, %s1069_s30  ;;  %p1071_p7 = pneg %p1288_p11 }
  0x2a   : > { %s1074_s12 = scalar_lea.hbm %s1510_s0, 4096  ;;  %p1075_p10 = scmp.lt.s32.totalorder %s1286_s24, %s1510_s0 }
  0x2b   : > { %p1072_p2 = pnand %p1071_p7, %p1070_p5  ;;  %p1076_p12 = scmp.lt.s32.totalorder %s1074_s12, %s1069_s30 }
  0x2d   : > { %p1073_p9 = pneg %p1072_p2  ;;  %p1077_p13 = por %p1076_p12, %p1075_p10 }
  0x2f   : > { %p1078_p0 = pnand %p1077_p13, %p1073_p9 }
  0x31   : > { %1081 = shalt.err (!%p1078_p0)
}
  0x32   : > { %s1082_s11 = scalar_lea.vmem %s1292_s26, 2048  ;;  %s1170_s20 = smov [#allocation2]  }
  0x33   : > { %p1083_p1 = scmp.ne.s32.totalorder %s1292_s26, %s1082_s11  ;;  %s1087_s25 = sshll.u32 %s1170_s20, 4  ;;  %s1088_s25 = int_to_ptr.vmem [resolvable:$false] %s1087_s25 }
  0x34   : > { %s1089_s7 = scalar_lea.vmem %s1088_s25, 4096  ;;  %p1090_p2 = scmp.lt.s32.totalorder %s1292_s26, %s1088_s25 }
  0x35   : > { %p1085_p6 = pnand %p1083_p1, %p1071_p7  ;;  %p1091_p3 = scmp.lt.s32.totalorder %s1089_s7, %s1082_s11 }
  0x37   : > { %p1086_p5 = pneg %p1085_p6  ;;  %p1092_p4 = por %p1091_p3, %p1090_p2 }
  0x39   : > { %p1093_p8 = pnand %p1092_p4, %p1086_p5 }
  0x3b   : > { %1096 = shalt.err (!%p1093_p8)
}
  0x3c   : > { %973 = dma.hbm_to_vmem [thread:$0]  (!%p1288_p11), %s1286_s24, 2048, %s1292_s26, %s1294_s29, %s1168_s5, %s1168_s5, %s1169_s6  }
  0x3d   : > { %p1526_p1 = scmp.ne.s32.totalorder %s1521_s23, 0 }
  0x3e   : > { %s1321_s30 = sand.u32 (!%p1526_p1), 1, %s1157_s16   ;;  %p1527_p4 = scmp.ne.s32.totalorder (!%p1526_p1), %s1519_s21, 0 }
  0x3f   : > { %196 = sbr.rel (%p1526_p1) target bundleno = 348 (0x15c), region = 36  ;;  %s834_s8 = sshll.u32 (!%p1526_p1), %s1321_s30, 7 }
  0x40   : > { %s199_s12 = scalar_lea.sflag (!%p1526_p1), [#allocation3], %s1321_s30  ;;  %s1325_s13 = scalar_lea.vmem (!%p1526_p1), [#allocation2], %s834_s8 }
  0x44   : > { %1140 = dma.done.wait (%p1527_p4), %s199_s12, 2048  }
  0x45   : > { %1142 = vsyncadd (%p1527_p4), %s199_s12, 4294965248  ;;  %p1528_p6 = scmp.eq.s32.totalorder %s1220_s19, 0 }
  0x47   : > { %1144 = dma.done.wait (%p1528_p6), [#allocation6], 1024   ;;  %p1529_p8 = pmov %p1528_p6 }
  0x48   : > { %v1019_v0 = vld [vmem:[#allocation5 + $0x38] sm:$0xff]   ;;  %v1020_v1 = vld [vmem:[#allocation5 + $0x30] sm:$0xff]   ;;  %v1021_v2 = vld [vmem:[#allocation5 + $0x28] sm:$0xff]   ;;  %s836_s24 = sshll.u32 %s1321_s30, 8  ;;  %s869_s28 = sshll.u32 %s1220_s19, 12 }
  0x49   : > { %1146 = vsyncadd (%p1529_p8), [#allocation6], 4294966272  ;;  %894 = vmatprep.subr.bf16.mxu0 %v1019_v0  ;;  %942 = vmatprep.subr.bf16.mxu1 %v1019_v0  ;;  %v1022_v3 = vld [vmem:[#allocation5 + $0x20] sm:$0xff]   ;;  %v1023_v6 = vld [vmem:[#allocation5 + $0x18] sm:$0xff]   ;;  %s1372_s26 = scalar_lea.vmem [#allocation7], %s836_s24  ;;  %s1461_s19 = scalar_lea.hbm %s1514_s4, %s869_s28 }
  0x4a   : > { %895 = vmatpush3.bf16.msra.mxu0 %v1019_v0  ;;  %950 = vmatpush3.bf16.msra.mxu1 %v1019_v0  ;;  %v1027_v4 = vld [vmem:[%s1325_s13] sm:$0xff]   ;;  %v1024_v7 = vld [vmem:[#allocation5 + $0x10] sm:$0xff]   ;;  %v1025_v8 = vld [vmem:[#allocation5 + $0x8] sm:$0xff]   ;;  %s743_s29 = sshll.u32 %s1372_s26, 4  ;;  %s730_s20 = scalar_lea.sflag [#allocation4], %s1321_s30  ;;  %s1463_s29 = int_to_ptr.vmem [resolvable:$true] %s743_s29 }
  0x4b   : > { %896 = vmatprep.subr.bf16.mxu0 %v1020_v1  ;;  %943 = vmatprep.subr.bf16.mxu1 %v1020_v1  ;;  %v1028_v5 = vld [vmem:[%s1325_s13 + $0x40] sm:$0xff]   ;;  %v1029_v10 = vld [vmem:[%s1325_s13 + $0x8] sm:$0xff]   ;;  %v1031_v12 = vld [vmem:[%s1325_s13 + $0x10] sm:$0xff]   ;;  %s1097_s25 = scalar_lea.vmem %s1463_s29, 4096  ;;  %p1530_p11 = scmp.ne.s32.totalorder %s1524_s10, 0 }
  0x4c   : > { %910 = vmatprep.mubr.bf16.mxu0 %v1027_v4  ;;  %926 = vmatprep.mubr.bf16.mxu1 %v1028_v5  ;;  %v1026_v9 = vld [vmem:[#allocation5] sm:$0xff]   ;;  %v1030_v11 = vld [vmem:[%s1325_s13 + $0x48] sm:$0xff]   ;;  %v1032_v13 = vld [vmem:[%s1325_s13 + $0x50] sm:$0xff]   ;;  %p1098_p3 = scmp.ne.s32.totalorder %s1463_s29, %s1097_s25  ;;  %s1171_s7 = smov [#allocation7]  }
  0x4d   : > { %v1033_v14 = vld [vmem:[%s1325_s13 + $0x18] sm:$0xff]   ;;  %v1035_v16 = vld [vmem:[%s1325_s13 + $0x20] sm:$0xff]   ;;  %v1037_v18 = vld [vmem:[%s1325_s13 + $0x28] sm:$0xff]   ;;  %s1101_s8 = sshll.u32 %s1171_s7, 4  ;;  %s1102_s8 = int_to_ptr.vmem [resolvable:$false] %s1101_s8 }
  0x4e   : > { %897 = vmatpush3.bf16.msra.mxu0 %v1020_v1  ;;  %951 = vmatpush3.bf16.msra.mxu1 %v1020_v1  ;;  %v1034_v15 = vld [vmem:[%s1325_s13 + $0x58] sm:$0xff]   ;;  %v1036_v17 = vld [vmem:[%s1325_s13 + $0x60] sm:$0xff]   ;;  %v1038_v19 = vld [vmem:[%s1325_s13 + $0x68] sm:$0xff]   ;;  %p1099_p7 = pnand %p1098_p3, %p1530_p11  ;;  %s1103_s12 = scalar_lea.vmem %s1102_s8, 8192 }
  0x4f   : > { %898 = vmatprep.subr.bf16.mxu0 %v1021_v2  ;;  %944 = vmatprep.subr.bf16.mxu1 %v1021_v2  ;;  %v1039_v20 = vld [vmem:[%s1325_s13 + $0x30] sm:$0xff]   ;;  %v1041_v22 = vld [vmem:[%s1325_s13 + $0x38] sm:$0xff]   ;;  %v1354_v24 = vld [vmem:[%s1512_s2] ss:$0 sm:$0xff]  ;;  %p1104_p10 = scmp.lt.s32.totalorder %s1463_s29, %s1102_s8  ;;  %p1105_p12 = scmp.lt.s32.totalorder %s1103_s12, %s1097_s25 }
  0x50   : > { %v1040_v21 = vld [vmem:[%s1325_s13 + $0x70] sm:$0xff]   ;;  %v1042_v23 = vld [vmem:[%s1325_s13 + $0x78] sm:$0xff]   ;;  %v1359_v26 = vld [vmem:[%s1513_s3] ss:$0 sm:$0xff]  ;;  %p1100_p9 = pneg %p1099_p7 }
  0x51   : > { %p1106_p13 = por %p1105_p12, %p1104_p10 }
  0x52   : > { %899 = vmatpush3.bf16.msra.mxu0 %v1021_v2  ;;  %952 = vmatpush3.bf16.msra.mxu1 %v1021_v2 }
  0x53   : > { %900 = vmatprep.subr.bf16.mxu0 %v1022_v3  ;;  %945 = vmatprep.subr.bf16.mxu1 %v1022_v3  ;;  %p1107_p0 = pnand %p1106_p13, %p1100_p9 }
  0x56   : > { %901 = vmatpush3.bf16.msra.mxu0 %v1022_v3  ;;  %953 = vmatpush3.bf16.msra.mxu1 %v1022_v3 }
  0x57   : > { %902 = vmatprep.subr.bf16.mxu0 %v1023_v6  ;;  %946 = vmatprep.subr.bf16.mxu1 %v1023_v6 }
  0x5a   : > { %903 = vmatpush3.bf16.msra.mxu0 %v1023_v6  ;;  %954 = vmatpush3.bf16.msra.mxu1 %v1023_v6 }
  0x5b   : > { %904 = vmatprep.subr.bf16.mxu0 %v1024_v7  ;;  %947 = vmatprep.subr.bf16.mxu1 %v1024_v7 }
  0x5e   : > { %905 = vmatpush3.bf16.msra.mxu0 %v1024_v7  ;;  %955 = vmatpush3.bf16.msra.mxu1 %v1024_v7 }
  0x5f   : > { %906 = vmatprep.subr.bf16.mxu0 %v1025_v8  ;;  %948 = vmatprep.subr.bf16.mxu1 %v1025_v8 }
  0x62   : > { %907 = vmatpush3.bf16.msra.mxu0 %v1025_v8  ;;  %956 = vmatpush3.bf16.msra.mxu1 %v1025_v8 }
  0x63   : > { %908 = vmatprep.subr.bf16.mxu0 %v1026_v9  ;;  %949 = vmatprep.subr.bf16.mxu1 %v1026_v9 }
  0x66   : > { %909 = vmatpush3.bf16.msra.mxu0 %v1026_v9  ;;  %957 = vmatpush3.bf16.msra.mxu1 %v1026_v9 }
  0x69   : > { %911 = vmatmul.mubr.bf16.vlgmr.msra.gmra.mxu0 %v1029_v10  ;;  %927 = vmatmul.mubr.bf16.vlgmr.msra.gmra.mxu1 %v1030_v11 }
  0x6a   : > { %914 = vmatprep.mubr.bf16.mxu0 %v1031_v12  ;;  %930 = vmatprep.mubr.bf16.mxu1 %v1032_v13 }
  0x71   : > { %915 = vmatmul.mubr.bf16.gmra.mxu0 %v1033_v14  ;;  %931 = vmatmul.mubr.bf16.gmra.mxu1 %v1034_v15 }
  0x72   : > { %918 = vmatprep.mubr.bf16.mxu0 %v1035_v16  ;;  %934 = vmatprep.mubr.bf16.mxu1 %v1036_v17 }
  0x79   : > { %919 = vmatmul.mubr.bf16.gmra.mxu0 %v1037_v18  ;;  %935 = vmatmul.mubr.bf16.gmra.mxu1 %v1038_v19 }
  0x7a   : > { %922 = vmatprep.mubr.bf16.mxu0 %v1039_v20  ;;  %938 = vmatprep.mubr.bf16.mxu1 %v1040_v21 }
  0x81   : > { %923 = vmatmul.mubr.bf16.gmra.mxu0 %v1041_v22  ;;  %939 = vmatmul.mubr.bf16.gmra.mxu1 %v1042_v23 }
 0x129   : > { %v912_v25 = vpop.f32.mrf.mxu0  ;;  %v928_v27 = vpop.f32.mrf.mxu1 }
 0x12a   : > { %v596_v28 = vmul.f32 %v912_v25, %v1354_v24  ;;  %v612_v29 = vmul.f32 %v928_v27, %v1354_v24 }
 0x12b   : > { %v460_v30 = vpop.f32.mrf.mxu0  ;;  %v524_v31 = vpop.f32.mrf.mxu1 }
 0x12c   : > { %v635_v32 = vadd.f32 %v1359_v26, %v596_v28  ;;  %v651_v33 = vadd.f32 %v1359_v26, %v612_v29  ;;  %v594_v34 = vmul.f32 %v1354_v24, %v460_v30  ;;  %v610_v35 = vmul.f32 %v1354_v24, %v524_v31 }
 0x12d   : > { %v913_v36 = vpop.f32.mrf.mxu0  ;;  %v929_v37 = vpop.f32.mrf.mxu1 }
 0x12e   : > { %v667_v38 = vmax.f32 %v635_v32, 0.0  ;;  %v683_v39 = vmax.f32 %v651_v33, 0.0  ;;  %v633_v40 = vadd.f32 %v1359_v26, %v594_v34  ;;  %v649_v41 = vadd.f32 %v1359_v26, %v610_v35 }
 0x12f   : > { %v597_v42 = vmul.f32 %v913_v36, %v1354_v24  ;;  %v613_v43 = vmul.f32 %v929_v37, %v1354_v24  ;;  %v463_v44 = vpop.f32.mrf.mxu0  ;;  %v527_v45 = vpop.f32.mrf.mxu1 }
 0x130   : > { %699 = vst [vmem:[%s1372_s26 + $0x10] sm:$0xff] %v667_v38  ;;  %715 = vst [vmem:[%s1372_s26 + $0x90] sm:$0xff] %v683_v39  ;;  %v665_v46 = vmax.f32 %v633_v40, 0.0  ;;  %v681_v47 = vmax.f32 %v649_v41, 0.0  ;;  %v595_v48 = vmul.f32 %v1354_v24, %v463_v44  ;;  %v611_v49 = vmul.f32 %v1354_v24, %v527_v45 }
 0x131   : > { %v636_v50 = vadd.f32 %v1359_v26, %v597_v42  ;;  %v652_v51 = vadd.f32 %v1359_v26, %v613_v43  ;;  %v916_v52 = vpop.f32.mrf.mxu0  ;;  %v932_v53 = vpop.f32.mrf.mxu1 }
 0x132   : > { %697 = vst [vmem:[%s1372_s26] sm:$0xff] %v665_v46  ;;  %713 = vst [vmem:[%s1372_s26 + $0x80] sm:$0xff] %v681_v47  ;;  %v634_v54 = vadd.f32 %v1359_v26, %v595_v48  ;;  %v650_v55 = vadd.f32 %v1359_v26, %v611_v49  ;;  %v600_v56 = vmul.f32 %v916_v52, %v1354_v24 }
 0x133   : > { %v616_v57 = vmul.f32 %v932_v53, %v1354_v24  ;;  %v668_v58 = vmax.f32 %v636_v50, 0.0  ;;  %v684_v59 = vmax.f32 %v652_v51, 0.0  ;;  %v476_v60 = vpop.f32.mrf.mxu0  ;;  %v540_v61 = vpop.f32.mrf.mxu1 }
 0x134   : > { %v666_v62 = vmax.f32 %v634_v54, 0.0  ;;  %v682_v63 = vmax.f32 %v650_v55, 0.0  ;;  %v639_v0 = vadd.f32 %v1359_v26, %v600_v56  ;;  %v598_v2 = vmul.f32 %v1354_v24, %v476_v60 }
 0x135   : > { %v655_v1 = vadd.f32 %v1359_v26, %v616_v57  ;;  %700 = vst [vmem:[%s1372_s26 + $0x18] sm:$0xff] %v668_v58  ;;  %716 = vst [vmem:[%s1372_s26 + $0x98] sm:$0xff] %v684_v59  ;;  %v614_v3 = vmul.f32 %v1354_v24, %v540_v61  ;;  %v917_v4 = vpop.f32.mrf.mxu0  ;;  %v933_v5 = vpop.f32.mrf.mxu1 }
 0x136   : > { %698 = vst [vmem:[%s1372_s26 + $0x8] sm:$0xff] %v666_v62  ;;  %714 = vst [vmem:[%s1372_s26 + $0x88] sm:$0xff] %v682_v63  ;;  %v671_v6 = vmax.f32 %v639_v0, 0.0  ;;  %v601_v8 = vmul.f32 %v917_v4, %v1354_v24  ;;  %v617_v9 = vmul.f32 %v933_v5, %v1354_v24  ;;  %v637_v10 = vadd.f32 %v1359_v26, %v598_v2 }
 0x137   : > { %v687_v7 = vmax.f32 %v655_v1, 0.0  ;;  %v653_v11 = vadd.f32 %v1359_v26, %v614_v3  ;;  %v479_v12 = vpop.f32.mrf.mxu0  ;;  %v543_v13 = vpop.f32.mrf.mxu1 }
 0x138   : > { %703 = vst [vmem:[%s1372_s26 + $0x30] sm:$0xff] %v671_v6  ;;  %v640_v14 = vadd.f32 %v1359_v26, %v601_v8  ;;  %v656_v15 = vadd.f32 %v1359_v26, %v617_v9  ;;  %v599_v16 = vmul.f32 %v1354_v24, %v479_v12  ;;  %v615_v17 = vmul.f32 %v1354_v24, %v543_v13 }
 0x139   : > { %719 = vst [vmem:[%s1372_s26 + $0xb0] sm:$0xff] %v687_v7  ;;  %v669_v18 = vmax.f32 %v637_v10, 0.0  ;;  %v685_v19 = vmax.f32 %v653_v11, 0.0  ;;  %v920_v20 = vpop.f32.mrf.mxu0  ;;  %v936_v21 = vpop.f32.mrf.mxu1 }
 0x13a   : > { %v672_v22 = vmax.f32 %v640_v14, 0.0  ;;  %v688_v23 = vmax.f32 %v656_v15, 0.0  ;;  %v638_v25 = vadd.f32 %v1359_v26, %v599_v16  ;;  %v654_v27 = vadd.f32 %v1359_v26, %v615_v17 }
 0x13b   : > { %701 = vst [vmem:[%s1372_s26 + $0x20] sm:$0xff] %v669_v18  ;;  %717 = vst [vmem:[%s1372_s26 + $0xa0] sm:$0xff] %v685_v19  ;;  %v604_v28 = vmul.f32 %v920_v20, %v1354_v24  ;;  %v620_v29 = vmul.f32 %v936_v21, %v1354_v24  ;;  %v492_v30 = vpop.f32.mrf.mxu0  ;;  %v556_v31 = vpop.f32.mrf.mxu1 }
 0x13c   : > { %704 = vst [vmem:[%s1372_s26 + $0x38] sm:$0xff] %v672_v22  ;;  %720 = vst [vmem:[%s1372_s26 + $0xb8] sm:$0xff] %v688_v23  ;;  %v670_v32 = vmax.f32 %v638_v25, 0.0  ;;  %v686_v33 = vmax.f32 %v654_v27, 0.0  ;;  %v602_v34 = vmul.f32 %v1354_v24, %v492_v30  ;;  %v618_v35 = vmul.f32 %v1354_v24, %v556_v31 }
 0x13d   : > { %v643_v36 = vadd.f32 %v1359_v26, %v604_v28  ;;  %v659_v37 = vadd.f32 %v1359_v26, %v620_v29  ;;  %v921_v38 = vpop.f32.mrf.mxu0  ;;  %v937_v39 = vpop.f32.mrf.mxu1 }
 0x13e   : > { %702 = vst [vmem:[%s1372_s26 + $0x28] sm:$0xff] %v670_v32  ;;  %718 = vst [vmem:[%s1372_s26 + $0xa8] sm:$0xff] %v686_v33  ;;  %v641_v40 = vadd.f32 %v1359_v26, %v602_v34  ;;  %v657_v41 = vadd.f32 %v1359_v26, %v618_v35  ;;  %v605_v42 = vmul.f32 %v921_v38, %v1354_v24 }
 0x13f   : > { %v621_v43 = vmul.f32 %v937_v39, %v1354_v24  ;;  %v675_v44 = vmax.f32 %v643_v36, 0.0  ;;  %v691_v45 = vmax.f32 %v659_v37, 0.0  ;;  %v495_v46 = vpop.f32.mrf.mxu0  ;;  %v559_v47 = vpop.f32.mrf.mxu1 }
 0x140   : > { %v673_v48 = vmax.f32 %v641_v40, 0.0  ;;  %v689_v49 = vmax.f32 %v657_v41, 0.0  ;;  %v644_v50 = vadd.f32 %v1359_v26, %v605_v42  ;;  %v603_v52 = vmul.f32 %v1354_v24, %v495_v46 }
 0x141   : > { %v660_v51 = vadd.f32 %v1359_v26, %v621_v43  ;;  %707 = vst [vmem:[%s1372_s26 + $0x50] sm:$0xff] %v675_v44  ;;  %723 = vst [vmem:[%s1372_s26 + $0xd0] sm:$0xff] %v691_v45  ;;  %v619_v53 = vmul.f32 %v1354_v24, %v559_v47  ;;  %v924_v54 = vpop.f32.mrf.mxu0  ;;  %v940_v55 = vpop.f32.mrf.mxu1 }
 0x142   : > { %705 = vst [vmem:[%s1372_s26 + $0x40] sm:$0xff] %v673_v48  ;;  %721 = vst [vmem:[%s1372_s26 + $0xc0] sm:$0xff] %v689_v49  ;;  %v676_v56 = vmax.f32 %v644_v50, 0.0  ;;  %v608_v58 = vmul.f32 %v924_v54, %v1354_v24  ;;  %v624_v59 = vmul.f32 %v940_v55, %v1354_v24  ;;  %v642_v60 = vadd.f32 %v1359_v26, %v603_v52 }
 0x143   : > { %v692_v57 = vmax.f32 %v660_v51, 0.0  ;;  %v658_v61 = vadd.f32 %v1359_v26, %v619_v53  ;;  %v508_v62 = vpop.f32.mrf.mxu0  ;;  %v572_v63 = vpop.f32.mrf.mxu1 }
 0x144   : > { %708 = vst [vmem:[%s1372_s26 + $0x58] sm:$0xff] %v676_v56  ;;  %v647_v0 = vadd.f32 %v1359_v26, %v608_v58  ;;  %v663_v1 = vadd.f32 %v1359_v26, %v624_v59  ;;  %v606_v2 = vmul.f32 %v1354_v24, %v508_v62  ;;  %v622_v3 = vmul.f32 %v1354_v24, %v572_v63 }
 0x145   : > { %724 = vst [vmem:[%s1372_s26 + $0xd8] sm:$0xff] %v692_v57  ;;  %v674_v4 = vmax.f32 %v642_v60, 0.0  ;;  %v690_v5 = vmax.f32 %v658_v61, 0.0  ;;  %v925_v6 = vpop.f32.mrf.mxu0  ;;  %v941_v7 = vpop.f32.mrf.mxu1 }
 0x146   : > { %v679_v8 = vmax.f32 %v647_v0, 0.0  ;;  %v695_v9 = vmax.f32 %v663_v1, 0.0  ;;  %v645_v10 = vadd.f32 %v1359_v26, %v606_v2  ;;  %v661_v11 = vadd.f32 %v1359_v26, %v622_v3 }
 0x147   : > { %706 = vst [vmem:[%s1372_s26 + $0x48] sm:$0xff] %v674_v4  ;;  %722 = vst [vmem:[%s1372_s26 + $0xc8] sm:$0xff] %v690_v5  ;;  %v609_v12 = vmul.f32 %v925_v6, %v1354_v24  ;;  %v625_v13 = vmul.f32 %v941_v7, %v1354_v24  ;;  %v511_v14 = vpop.f32.mrf.mxu0  ;;  %v575_v15 = vpop.f32.mrf.mxu1 }
 0x148   : > { %711 = vst [vmem:[%s1372_s26 + $0x70] sm:$0xff] %v679_v8  ;;  %727 = vst [vmem:[%s1372_s26 + $0xf0] sm:$0xff] %v695_v9  ;;  %v677_v16 = vmax.f32 %v645_v10, 0.0  ;;  %v693_v17 = vmax.f32 %v661_v11, 0.0  ;;  %v607_v18 = vmul.f32 %v1354_v24, %v511_v14  ;;  %v623_v19 = vmul.f32 %v1354_v24, %v575_v15 }
 0x149   : > { %v648_v20 = vadd.f32 %v1359_v26, %v609_v12  ;;  %v664_v21 = vadd.f32 %v1359_v26, %v625_v13 }
 0x14a   : > { %709 = vst [vmem:[%s1372_s26 + $0x60] sm:$0xff] %v677_v16  ;;  %725 = vst [vmem:[%s1372_s26 + $0xe0] sm:$0xff] %v693_v17  ;;  %v646_v22 = vadd.f32 %v1359_v26, %v607_v18  ;;  %v662_v23 = vadd.f32 %v1359_v26, %v623_v19 }
 0x14b   : > { %v680_v25 = vmax.f32 %v648_v20, 0.0  ;;  %v696_v27 = vmax.f32 %v664_v21, 0.0 }
 0x14c   : > { %v678_v24 = vmax.f32 %v646_v22, 0.0  ;;  %v694_v28 = vmax.f32 %v662_v23, 0.0 }
 0x14d   : > { %712 = vst [vmem:[%s1372_s26 + $0x78] sm:$0xff] %v680_v25  ;;  %728 = vst [vmem:[%s1372_s26 + $0xf8] sm:$0xff] %v696_v27 }
 0x14e   : > { %710 = vst [vmem:[%s1372_s26 + $0x68] sm:$0xff] %v678_v24  ;;  %726 = vst [vmem:[%s1372_s26 + $0xe8] sm:$0xff] %v694_v28 }
 0x14f   : > { %1110 = shalt.err (!%p1107_p0)
}
 0x150   : > { %s1111_s13 = scalar_lea.hbm %s1461_s19, 4096  ;;  %s1115_s5 = scalar_lea.hbm %s1514_s4, 8192 }
 0x151   : > { %p1112_p5 = scmp.ne.s32.totalorder %s1461_s19, %s1111_s13  ;;  %p1116_p4 = scmp.lt.s32.totalorder %s1461_s19, %s1514_s4 }
 0x152   : > { %p1117_p6 = scmp.lt.s32.totalorder %s1115_s5, %s1111_s13 }
 0x153   : > { %p1113_p2 = pnand %p1112_p5, %p1530_p11 }
 0x154   : > { %p1118_p8 = por %p1117_p6, %p1116_p4 }
 0x155   : > { %p1114_p1 = pneg %p1113_p2 }
 0x157   : > { %p1119_p3 = pnand %p1118_p8, %p1114_p1 }
 0x159   : > { %1122 = shalt.err (!%p1119_p3)
}
 0x15a   : > { %s1172_s26 = smov 128   ;;  %s1173_s28 = smov 8  }
 0x15b   : > { %964 = dma.vmem_to_hbm [thread:$0]  (%p1530_p11), %s1463_s29, 4096, %s1461_s19, %s730_s20, %s1172_s26, %s1172_s26, %s1173_s28  }
 0x15c PF: > { %s758_s14 = sand.u32 1, %s1153_s15   ;;  %p1531_p7 = scmp.ne.s32.totalorder %s1520_s22, 0 }
 0x15d   : > { %p1532_p9 = scmp.ge.s32.totalorder %s1165_s18, 2  ;;  %s759_s11 = scalar_lea.sflag [#allocation4], %s758_s14 }
 0x15f   : > { %p975_p10 = pnand %p1532_p9, %p1531_p7 }
 0x161   : > { %p976_p12 = pneg %p975_p10 }
 0x163   : > { %1148 = dma.done.wait (%p976_p12), %s759_s11, 4096  }
 0x164   : > { %1150 = vsyncadd (%p976_p12), %s759_s11, 4294963200  ;;  %p18_p13 = scmp.ge.s32.totalorder %s1253_s27, 4   ;;  %s1533_s15 = smov %s1157_s16 }
 0x165   : > { %s1534_s16 = smov %s1161_s17  ;;  %s1535_s17 = smov %s1273_s9 }
 0x166   : > { %s1536_s18 = smov %s1253_s27  ;;  %20 = sbr.rel (!%p18_p13) target bundleno = 6 (0x6), region = 85 }
 0x16b   :  { %764 = vsyncpa [#allocation3], 1 }
 0x16c   :  { %766 = vsyncpa [#allocation3 + $0x1], 1 }
 0x16d   :  { %767 = vsyncpa [#allocation6], 1 }
 0x16e   :  { %768 = vsyncpa [#allocation4], 1 }
 0x16f   :  { %770 = vsyncpa [#allocation4 + $0x1], 1 }

</bundles_post_ra>
